<compile_context>
chip_gen: v6e
topology: v6e:2x2x1
jax: 0.10.0
libtpu: 0.0.40
codegen_flags: <defaults>
</compile_context>

<pallas_src>
import functools

import jax
import jax.numpy as jnp
from jax.experimental import pallas as pl
from jax.experimental.pallas import tpu as pltpu


def _round_up(x, m):
    return (x + m - 1) // m * m


# ---------------------------------------------------------------------------
# Kernel: one (TB, D) row-tile of x against the full (D, OP) weight.
# OP is the output dim padded to a multiple of 128 -> lane-dense stores.
# ---------------------------------------------------------------------------
def _linear_kernel(x_ref, w_ref, b_ref, o_ref):
    o_ref[...] = (
        jnp.dot(x_ref[...], w_ref[...], preferred_element_type=jnp.float32)
        + b_ref[...]
    )


def _pick_row_tile(B, max_rows):
    """Largest multiple-of-8 row tile <= max_rows, preferring >=2 grid steps."""
    tb = min(max_rows, _round_up(B, 8))
    if B > 8 and tb >= B:
        tb = max(8, _round_up(B // 2, 8))  # guarantee >=2 pipeline steps
    return tb


# ---------------------------------------------------------------------------
# Wrapper: PyTorch nn.Linear semantics  y = x @ weight.T + bias
#   x:      (..., D) f32
#   weight: (O, D)   f32   (PyTorch layout)
#   bias:   (O,)     f32
# ---------------------------------------------------------------------------
@functools.partial(jax.jit, static_argnames=("block_rows",))
def linear_forward(x, weight, bias, *, block_rows=256):
    *lead, D = x.shape
    O = weight.shape[0]

    x2 = x.reshape(-1, D).astype(jnp.float32)
    B = x2.shape[0]

    # Lane-dense output: pad output dim up to a multiple of 128.
    OP = _round_up(max(O, 1), 128)
    w_pad = jnp.zeros((D, OP), jnp.float32).at[:, :O].set(weight.astype(jnp.float32).T)
    b_pad = jnp.zeros((1, OP), jnp.float32).at[0, :O].set(bias.astype(jnp.float32))

    # Row tiling: biggest tile that keeps VMEM tiny and the pipeline >=2 deep.
    tb = _pick_row_tile(B, block_rows)
    Bp = _round_up(B, tb)
    if Bp != B:
        x2 = jnp.pad(x2, ((0, Bp - B), (0, 0)))

    out = pl.pallas_call(
        _linear_kernel,
        out_shape=jax.ShapeDtypeStruct((Bp, OP), jnp.float32),
        grid=(Bp // tb,),
        in_specs=[
            pl.BlockSpec((tb, D), lambda i: (i, 0)),     # x row tile
            pl.BlockSpec((D, OP), lambda i: (0, 0)),     # weight, resident
            pl.BlockSpec((1, OP), lambda i: (0, 0)),     # bias, resident
        ],
        out_specs=pl.BlockSpec((tb, OP), lambda i: (i, 0)),
        compiler_params=pltpu.CompilerParams(
            dimension_semantics=("parallel",),
        ),
    )(x2, w_pad, b_pad)

    return out[:B, :O].reshape(*lead, O)


# ---------------------------------------------------------------------------
if __name__ == "__main__":
    input_dim, output_dim, batch = 768, 2, 16

    key = jax.random.PRNGKey(0)
    kx, kw, kb = jax.random.split(key, 3)

    x = jax.random.normal(kx, (batch, input_dim), jnp.float32)
    # PyTorch nn.Linear default init: U(-1/sqrt(D), 1/sqrt(D))
    bound = 1.0 / (input_dim ** 0.5)
    w = jax.random.uniform(kw, (output_dim, input_dim), jnp.float32, -bound, bound)
    b = jax.random.uniform(kb, (output_dim,), jnp.float32, -bound, bound)

    out = jax.block_until_ready(linear_forward(x, w, b))
    assert out.shape == (batch, output_dim), (out.shape, (batch, output_dim))

    ref = jnp.dot(x, w.T, precision=jax.lax.Precision.HIGHEST) + b[None, :]
    max_err = float(jnp.max(jnp.abs(out - ref)))
    assert jnp.allclose(out, ref, rtol=2e-3, atol=2e-3), max_err

    print("KERNEL_OK")
</pallas_src>

<mosaic_0001>
module attributes {stable_mosaic.version = 11 : i64} {
  func.func @_linear_kernel(%arg0: i32, %arg1: memref<8x768xf32, #tpu.memory_space<vmem>>, %arg2: memref<768x128xf32, #tpu.memory_space<vmem>>, %arg3: memref<1x128xf32, #tpu.memory_space<vmem>>, %arg4: memref<8x128xf32, #tpu.memory_space<vmem>>) attributes {dimension_semantics = [#tpu.dimension_semantics<parallel>], iteration_bounds = array<i64: 2>, scalar_prefetch = 0 : i64, scratch_operands = 0 : i64, tpu.core_type = #tpu.core_type<tc>, window_params = [{transform_indices = @transform_0, window_bounds = array<i64: 8, 768>}, {pipeline_mode = #tpu.pipeline_mode<synchronous>, transform_indices = @transform_1, window_bounds = array<i64: 768, 128>}, {pipeline_mode = #tpu.pipeline_mode<synchronous>, transform_indices = @transform_2, window_bounds = array<i64: 1, 128>}, {transform_indices = @transform_3, window_bounds = array<i64: 8, 128>}]} {
    %c0 = arith.constant 0 : index
    %c0_0 = arith.constant 0 : index
    %0 = vector.load %arg1[%c0, %c0_0] : memref<8x768xf32, #tpu.memory_space<vmem>>, vector<8x768xf32>
    %c0_1 = arith.constant 0 : index
    %c0_2 = arith.constant 0 : index
    %1 = vector.load %arg2[%c0_1, %c0_2] : memref<768x128xf32, #tpu.memory_space<vmem>>, vector<768x128xf32>
    %cst = arith.constant dense<0.000000e+00> : vector<8x128xf32>
    %2 = tpu.matmul %0, %1, %cst {dimension_numbers = #tpu.dot_dimension_numbers<[1], [0], [0], [1], [0, 0, 1, 1], [], []>} : vector<8x768xf32>, vector<768x128xf32>, vector<8x128xf32> -> vector<8x128xf32>
    %c0_3 = arith.constant 0 : index
    %c0_4 = arith.constant 0 : index
    %3 = vector.load %arg3[%c0_3, %c0_4] : memref<1x128xf32, #tpu.memory_space<vmem>>, vector<1x128xf32>
    %4 = vector.broadcast %3 : vector<1x128xf32> to vector<8x128xf32>
    %5 = arith.addf %2, %4 : vector<8x128xf32>
    %c0_5 = arith.constant 0 : index
    %c0_6 = arith.constant 0 : index
    %6 = vector.load %arg4[%c0_5, %c0_6] : memref<8x128xf32, #tpu.memory_space<vmem>>, vector<8x128xf32>
    tpu.vector_store %arg4[%c0_5, %c0_6], %5 {strides = array<i32>} : memref<8x128xf32, #tpu.memory_space<vmem>>, vector<8x128xf32>,
    return
  }
  func.func @transform_0(%arg0: i32) -> (i32, i32) {
    %c0_i32 = arith.constant 0 : i32
    %c0_i32_0 = arith.constant 0 : i32
    return %arg0, %c0_i32 : i32, i32
  }
  func.func @transform_1(%arg0: i32) -> (i32, i32) {
    %c0_i32 = arith.constant 0 : i32
    %c0_i32_0 = arith.constant 0 : i32
    %c0_i32_1 = arith.constant 0 : i32
    return %c0_i32, %c0_i32_0 : i32, i32
  }
  func.func @transform_2(%arg0: i32) -> (i32, i32) {
    %c0_i32 = arith.constant 0 : i32
    %c0_i32_0 = arith.constant 0 : i32
    %c0_i32_1 = arith.constant 0 : i32
    return %c0_i32, %c0_i32_0 : i32, i32
  }
  func.func @transform_3(%arg0: i32) -> (i32, i32) {
    %c0_i32 = arith.constant 0 : i32
    %c0_i32_0 = arith.constant 0 : i32
    return %arg0, %c0_i32 : i32, i32
  }
}

</mosaic_0001>

<bundles_post_ra>
// kernel: linear_forward.1
= control target key start
LH: loop header
LB: loop body
LE: loop exit
PB: predicated region body
PF: predicated region fallthrough
CT: control target
= control target key end

     0   :  { %s694_s12 = smov 0   ;;  %s1024_s0 = inlined_call_operand.vmem [shape: f32[16,768], index: 0, kind: input, shape index: {}]   ;;  %s1025_s1 = inlined_call_operand.vmem [shape: f32[768,128], index: 1, kind: input, shape index: {}]   ;;  %s1026_s2 = inlined_call_operand.vmem [shape: f32[1,128], index: 2, kind: input, shape index: {}]   ;;  %s1027_s3 = inlined_call_operand.vmem [shape: f32[16,128], index: 3, kind: output, shape index: {}]  }
   0x1 LB: > { %s542_s13 = sadd.s32 4294967295, %s672_s12   ;;  %p546_p0 = scmp.ge.s32.totalorder %s672_s12, 1  ;;  %s672_s12 = sphi %s694_s12, %s13_s12  }
   0x2   : > { %p137_p1 = scmp.lt.s32.totalorder %s672_s12, 3 }
   0x4   : > { %p138_p2 = pnand %p546_p0, %p137_p1 }
   0x5   : > { %p797_p3 = scmp.lt.s32.totalorder (!%p138_p2), %s542_s13, 1 }
   0x6   : > { %141 = sbr.rel (%p138_p2) target bundleno = 278 (0x116), region = 32 }
   0xb   : > { %v206_v0 = vld [vmem:[%s1025_s1 + $0xf8] sm:$0xff]  ;;  %v205_v2 = vld [vmem:[%s1025_s1 + $0xf0] sm:$0xff]  ;;  %v204_v6 = vld [vmem:[%s1025_s1 + $0xe8] sm:$0xff]  ;;  %s1030_s13 = smov (!%p797_p3, %s542_s13), 1 }
   0xc   : > { %v190_v1 = vld [vmem:[%s1025_s1 + $0x78] sm:$0xff]  ;;  %552 = vmatprep.subr.mxu0 %v206_v0  ;;  %v189_v4 = vld [vmem:[%s1025_s1 + $0x70] sm:$0xff]  ;;  %v188_v8 = vld [vmem:[%s1025_s1 + $0x68] sm:$0xff]  ;;  %s657_s7 = smul.u32 48, %s1030_s13  ;;  %s548_s16 = sshll.u32 %s1030_s13, 3 }
   0xd   : > { %v238_v3 = vld [vmem:[%s1025_s1 + $0x1f8] sm:$0xff]  ;;  %553 = vmatpush3.msra.mxu0 %v190_v1  ;;  %v237_v7 = vld [vmem:[%s1025_s1 + $0x1f0] sm:$0xff]  ;;  %v236_v10 = vld [vmem:[%s1025_s1 + $0x1e8] sm:$0xff]  ;;  %s168_s18 = scalar_lea.vmem %s1027_s3, %s548_s16 }
   0xe   : > { %v222_v5 = vld [vmem:[%s1025_s1 + $0x178] sm:$0xff]  ;;  %587 = vmatprep.subr.mxu1 %v238_v3  ;;  %554 = vmatprep.subr.mxu0 %v205_v2  ;;  %v221_v9 = vld [vmem:[%s1025_s1 + $0x170] sm:$0xff]  ;;  %v203_v11 = vld [vmem:[%s1025_s1 + $0xe0] sm:$0xff]  ;;  %s883_s28 = scalar_lea.vmem %s1024_s0, %s657_s7 }
   0xf   : > { %588 = vmatpush3.msra.mxu1 %v222_v5  ;;  %555 = vmatpush3.msra.mxu0 %v189_v4  ;;  %v220_v12 = vld [vmem:[%s1025_s1 + $0x168] sm:$0xff]  ;;  %v187_v13 = vld [vmem:[%s1025_s1 + $0x60] sm:$0xff]  ;;  %v202_v15 = vld [vmem:[%s1025_s1 + $0xd8] sm:$0xff] }
  0x10   : > { %589 = vmatprep.subr.mxu1 %v237_v7  ;;  %556 = vmatprep.subr.mxu0 %v204_v6  ;;  %v235_v14 = vld [vmem:[%s1025_s1 + $0x1e0] sm:$0xff]  ;;  %v186_v17 = vld [vmem:[%s1025_s1 + $0x58] sm:$0xff]  ;;  %v201_v19 = vld [vmem:[%s1025_s1 + $0xd0] sm:$0xff] }
  0x11   : > { %590 = vmatpush3.msra.mxu1 %v221_v9  ;;  %557 = vmatpush3.msra.mxu0 %v188_v8  ;;  %v219_v16 = vld [vmem:[%s1025_s1 + $0x160] sm:$0xff]  ;;  %v234_v18 = vld [vmem:[%s1025_s1 + $0x1d8] sm:$0xff]  ;;  %v185_v21 = vld [vmem:[%s1025_s1 + $0x50] sm:$0xff] }
  0x12   : > { %591 = vmatprep.subr.mxu1 %v236_v10  ;;  %558 = vmatprep.subr.mxu0 %v203_v11  ;;  %v218_v20 = vld [vmem:[%s1025_s1 + $0x158] sm:$0xff]  ;;  %v233_v22 = vld [vmem:[%s1025_s1 + $0x1d0] sm:$0xff]  ;;  %v200_v23 = vld [vmem:[%s1025_s1 + $0xc8] sm:$0xff] }
  0x13   : > { %592 = vmatpush3.msra.mxu1 %v220_v12  ;;  %559 = vmatpush3.msra.mxu0 %v187_v13  ;;  %v217_v24 = vld [vmem:[%s1025_s1 + $0x150] sm:$0xff]  ;;  %v184_v25 = vld [vmem:[%s1025_s1 + $0x48] sm:$0xff]  ;;  %v199_v27 = vld [vmem:[%s1025_s1 + $0xc0] sm:$0xff] }
  0x14   : > { %593 = vmatprep.subr.mxu1 %v235_v14  ;;  %560 = vmatprep.subr.mxu0 %v202_v15  ;;  %v232_v26 = vld [vmem:[%s1025_s1 + $0x1c8] sm:$0xff]  ;;  %v183_v29 = vld [vmem:[%s1025_s1 + $0x40] sm:$0xff]  ;;  %v198_v31 = vld [vmem:[%s1025_s1 + $0xb8] sm:$0xff] }
  0x15   : > { %594 = vmatpush3.msra.mxu1 %v219_v16  ;;  %561 = vmatpush3.msra.mxu0 %v186_v17  ;;  %v216_v28 = vld [vmem:[%s1025_s1 + $0x148] sm:$0xff]  ;;  %v231_v30 = vld [vmem:[%s1025_s1 + $0x1c0] sm:$0xff]  ;;  %v182_v33 = vld [vmem:[%s1025_s1 + $0x38] sm:$0xff] }
  0x16   : > { %595 = vmatprep.subr.mxu1 %v234_v18  ;;  %562 = vmatprep.subr.mxu0 %v201_v19  ;;  %v215_v32 = vld [vmem:[%s1025_s1 + $0x140] sm:$0xff]  ;;  %v230_v34 = vld [vmem:[%s1025_s1 + $0x1b8] sm:$0xff]  ;;  %v197_v35 = vld [vmem:[%s1025_s1 + $0xb0] sm:$0xff] }
  0x17   : > { %596 = vmatpush3.msra.mxu1 %v218_v20  ;;  %563 = vmatpush3.msra.mxu0 %v185_v21  ;;  %v214_v36 = vld [vmem:[%s1025_s1 + $0x138] sm:$0xff]  ;;  %v181_v37 = vld [vmem:[%s1025_s1 + $0x30] sm:$0xff]  ;;  %v196_v39 = vld [vmem:[%s1025_s1 + $0xa8] sm:$0xff] }
  0x18   : > { %597 = vmatprep.subr.mxu1 %v233_v22  ;;  %564 = vmatprep.subr.mxu0 %v200_v23  ;;  %v229_v38 = vld [vmem:[%s1025_s1 + $0x1b0] sm:$0xff]  ;;  %v180_v41 = vld [vmem:[%s1025_s1 + $0x28] sm:$0xff]  ;;  %v195_v43 = vld [vmem:[%s1025_s1 + $0xa0] sm:$0xff] }
  0x19   : > { %598 = vmatpush3.msra.mxu1 %v217_v24  ;;  %565 = vmatpush3.msra.mxu0 %v184_v25  ;;  %v213_v40 = vld [vmem:[%s1025_s1 + $0x130] sm:$0xff]  ;;  %v228_v42 = vld [vmem:[%s1025_s1 + $0x1a8] sm:$0xff]  ;;  %v179_v45 = vld [vmem:[%s1025_s1 + $0x20] sm:$0xff] }
  0x1a   : > { %599 = vmatprep.subr.mxu1 %v232_v26  ;;  %566 = vmatprep.subr.mxu0 %v199_v27  ;;  %v212_v44 = vld [vmem:[%s1025_s1 + $0x128] sm:$0xff]  ;;  %v227_v46 = vld [vmem:[%s1025_s1 + $0x1a0] sm:$0xff]  ;;  %v194_v47 = vld [vmem:[%s1025_s1 + $0x98] sm:$0xff] }
  0x1b   : > { %600 = vmatpush3.msra.mxu1 %v216_v28  ;;  %567 = vmatpush3.msra.mxu0 %v183_v29  ;;  %v211_v48 = vld [vmem:[%s1025_s1 + $0x120] sm:$0xff]  ;;  %v178_v49 = vld [vmem:[%s1025_s1 + $0x18] sm:$0xff]  ;;  %v193_v51 = vld [vmem:[%s1025_s1 + $0x90] sm:$0xff] }
  0x1c   : > { %601 = vmatprep.subr.mxu1 %v231_v30  ;;  %568 = vmatprep.subr.mxu0 %v198_v31  ;;  %v226_v50 = vld [vmem:[%s1025_s1 + $0x198] sm:$0xff]  ;;  %v177_v53 = vld [vmem:[%s1025_s1 + $0x10] sm:$0xff]  ;;  %v192_v55 = vld [vmem:[%s1025_s1 + $0x88] sm:$0xff] }
  0x1d   : > { %602 = vmatpush3.msra.mxu1 %v215_v32  ;;  %569 = vmatpush3.msra.mxu0 %v182_v33  ;;  %v210_v52 = vld [vmem:[%s1025_s1 + $0x118] sm:$0xff]  ;;  %v225_v54 = vld [vmem:[%s1025_s1 + $0x190] sm:$0xff]  ;;  %v176_v57 = vld [vmem:[%s1025_s1 + $0x8] sm:$0xff] }
  0x1e   : > { %603 = vmatprep.subr.mxu1 %v230_v34  ;;  %570 = vmatprep.subr.mxu0 %v197_v35  ;;  %v209_v56 = vld [vmem:[%s1025_s1 + $0x110] sm:$0xff]  ;;  %v224_v58 = vld [vmem:[%s1025_s1 + $0x188] sm:$0xff]  ;;  %v191_v59 = vld [vmem:[%s1025_s1 + $0x80] sm:$0xff] }
  0x1f   : > { %604 = vmatpush3.msra.mxu1 %v214_v36  ;;  %571 = vmatpush3.msra.mxu0 %v181_v37  ;;  %v170_v60 = vld [vmem:[%s883_s28 + $0x8] sm:$0xff]  ;;  %v175_v61 = vld [vmem:[%s1025_s1] sm:$0xff]  ;;  %v270_v1 = vld [vmem:[%s1025_s1 + $0x2f8] sm:$0xff] }
  0x20   : > { %605 = vmatprep.subr.mxu1 %v229_v38  ;;  %572 = vmatprep.subr.mxu0 %v196_v39  ;;  %v208_v62 = vld [vmem:[%s1025_s1 + $0x108] sm:$0xff]  ;;  %v169_v63 = vld [vmem:[%s883_s28] sm:$0xff]  ;;  %v172_v3 = vld [vmem:[%s883_s28 + $0x18] sm:$0xff] }
  0x21   : > { %606 = vmatpush3.msra.mxu1 %v213_v40  ;;  %573 = vmatpush3.msra.mxu0 %v180_v41  ;;  %v223_v0 = vld [vmem:[%s1025_s1 + $0x180] sm:$0xff]  ;;  %v254_v4 = vld [vmem:[%s1025_s1 + $0x278] sm:$0xff]  ;;  %v171_v5 = vld [vmem:[%s883_s28 + $0x10] sm:$0xff] }
  0x22   : > { %607 = vmatprep.subr.mxu1 %v228_v42  ;;  %574 = vmatprep.subr.mxu0 %v195_v43  ;;  %v207_v2 = vld [vmem:[%s1025_s1 + $0x100] sm:$0xff]  ;;  %v269_v6 = vld [vmem:[%s1025_s1 + $0x2f0] sm:$0xff]  ;;  %v174_v8 = vld [vmem:[%s883_s28 + $0x28] sm:$0xff] }
  0x23   : > { %608 = vmatpush3.msra.mxu1 %v212_v44  ;;  %575 = vmatpush3.msra.mxu0 %v179_v45  ;;  %v253_v7 = vld [vmem:[%s1025_s1 + $0x270] sm:$0xff]  ;;  %v268_v9 = vld [vmem:[%s1025_s1 + $0x2e8] sm:$0xff]  ;;  %v267_v11 = vld [vmem:[%s1025_s1 + $0x2e0] sm:$0xff] }
  0x24   : > { %609 = vmatprep.subr.mxu1 %v227_v46  ;;  %576 = vmatprep.subr.mxu0 %v194_v47  ;;  %v252_v10 = vld [vmem:[%s1025_s1 + $0x268] sm:$0xff]  ;;  %v251_v12 = vld [vmem:[%s1025_s1 + $0x260] sm:$0xff]  ;;  %v266_v13 = vld [vmem:[%s1025_s1 + $0x2d8] sm:$0xff] }
  0x25   : > { %610 = vmatpush3.msra.mxu1 %v211_v48  ;;  %577 = vmatpush3.msra.mxu0 %v178_v49  ;;  %v250_v14 = vld [vmem:[%s1025_s1 + $0x258] sm:$0xff]  ;;  %v265_v15 = vld [vmem:[%s1025_s1 + $0x2d0] sm:$0xff]  ;;  %v264_v17 = vld [vmem:[%s1025_s1 + $0x2c8] sm:$0xff] }
  0x26   : > { %611 = vmatprep.subr.mxu1 %v226_v50  ;;  %578 = vmatprep.subr.mxu0 %v193_v51  ;;  %v249_v16 = vld [vmem:[%s1025_s1 + $0x250] sm:$0xff]  ;;  %v248_v18 = vld [vmem:[%s1025_s1 + $0x248] sm:$0xff]  ;;  %v263_v19 = vld [vmem:[%s1025_s1 + $0x2c0] sm:$0xff] }
  0x27   : > { %612 = vmatpush3.msra.mxu1 %v210_v52  ;;  %579 = vmatpush3.msra.mxu0 %v177_v53  ;;  %v247_v20 = vld [vmem:[%s1025_s1 + $0x240] sm:$0xff]  ;;  %v262_v21 = vld [vmem:[%s1025_s1 + $0x2b8] sm:$0xff]  ;;  %v261_v23 = vld [vmem:[%s1025_s1 + $0x2b0] sm:$0xff] }
  0x28   : > { %613 = vmatprep.subr.mxu1 %v225_v54  ;;  %580 = vmatprep.subr.mxu0 %v192_v55  ;;  %v246_v22 = vld [vmem:[%s1025_s1 + $0x238] sm:$0xff]  ;;  %v245_v24 = vld [vmem:[%s1025_s1 + $0x230] sm:$0xff]  ;;  %v260_v25 = vld [vmem:[%s1025_s1 + $0x2a8] sm:$0xff] }
  0x29   : > { %614 = vmatpush3.msra.mxu1 %v209_v56  ;;  %581 = vmatpush3.msra.mxu0 %v176_v57  ;;  %v244_v26 = vld [vmem:[%s1025_s1 + $0x228] sm:$0xff]  ;;  %v259_v27 = vld [vmem:[%s1025_s1 + $0x2a0] sm:$0xff]  ;;  %v258_v29 = vld [vmem:[%s1025_s1 + $0x298] sm:$0xff] }
  0x2a   : > { %615 = vmatprep.subr.mxu1 %v224_v58  ;;  %582 = vmatprep.subr.mxu0 %v191_v59  ;;  %v243_v28 = vld [vmem:[%s1025_s1 + $0x220] sm:$0xff]  ;;  %v242_v30 = vld [vmem:[%s1025_s1 + $0x218] sm:$0xff]  ;;  %v257_v31 = vld [vmem:[%s1025_s1 + $0x290] sm:$0xff] }
  0x2b   : > { %342 = vmatprep.mubr.f32.mxu0 %v170_v60  ;;  %583 = vmatpush3.msra.mxu0 %v175_v61  ;;  %v241_v32 = vld [vmem:[%s1025_s1 + $0x210] sm:$0xff]  ;;  %v256_v33 = vld [vmem:[%s1025_s1 + $0x288] sm:$0xff]  ;;  %v255_v35 = vld [vmem:[%s1025_s1 + $0x280] sm:$0xff] }
  0x2c   : > { %616 = vmatpush3.msra.mxu1 %v208_v62  ;;  %343 = vmatmul.mubr.f32.vlgmr.msra.gmra.mxu0 %v169_v63  ;;  %v240_v34 = vld [vmem:[%s1025_s1 + $0x208] sm:$0xff]  ;;  %v239_v36 = vld [vmem:[%s1025_s1 + $0x200] sm:$0xff] }
  0x2d   : > { %617 = vmatprep.subr.mxu1 %v223_v0  ;;  %622 = vmatprep.subr.mxu0 %v270_v1  ;;  %v173_v37 = vld [vmem:[%s883_s28 + $0x20] sm:$0xff] }
  0x2e   : > { %618 = vmatpush3.msra.mxu1 %v207_v2  ;;  %412 = vmatprep.mubr.f32.mxu1 %v172_v3  ;;  %v549_v42 = vld [vmem:[%s1026_s2] ss:$0 sm:$0xff] }
  0x2f   : > { %623 = vmatpush3.msra.mxu0 %v254_v4  ;;  %413 = vmatmul.mubr.f32.vlgmr.msra.gmra.mxu1 %v171_v5 }
  0x30   : > { %624 = vmatprep.subr.mxu0 %v269_v6  ;;  %482 = vmatprep.mubr.f32.mxu0 %v174_v8 }
  0x31   : > { %625 = vmatpush3.msra.mxu0 %v253_v7 }
  0x32   : > { %626 = vmatprep.subr.mxu0 %v268_v9 }
  0x33   : > { %627 = vmatpush3.msra.mxu0 %v252_v10 }
  0x34   : > { %628 = vmatprep.subr.mxu0 %v267_v11 }
  0x35   : > { %629 = vmatpush3.msra.mxu0 %v251_v12 }
  0x36   : > { %630 = vmatprep.subr.mxu0 %v266_v13 }
  0x37   : > { %631 = vmatpush3.msra.mxu0 %v250_v14 }
  0x38   : > { %632 = vmatprep.subr.mxu0 %v265_v15 }
  0x39   : > { %633 = vmatpush3.msra.mxu0 %v249_v16 }
  0x3a   : > { %634 = vmatprep.subr.mxu0 %v264_v17 }
  0x3b   : > { %635 = vmatpush3.msra.mxu0 %v248_v18 }
  0x3c   : > { %636 = vmatprep.subr.mxu0 %v263_v19 }
  0x3d   : > { %637 = vmatpush3.msra.mxu0 %v247_v20 }
  0x3e   : > { %638 = vmatprep.subr.mxu0 %v262_v21 }
  0x3f   : > { %639 = vmatpush3.msra.mxu0 %v246_v22 }
  0x40   : > { %640 = vmatprep.subr.mxu0 %v261_v23 }
  0x41   : > { %641 = vmatpush3.msra.mxu0 %v245_v24 }
  0x42   : > { %642 = vmatprep.subr.mxu0 %v260_v25 }
  0x43   : > { %643 = vmatpush3.msra.mxu0 %v244_v26 }
  0x44   : > { %644 = vmatprep.subr.mxu0 %v259_v27 }
  0x45   : > { %645 = vmatpush3.msra.mxu0 %v243_v28 }
  0x46   : > { %646 = vmatprep.subr.mxu0 %v258_v29 }
  0x47   : > { %647 = vmatpush3.msra.mxu0 %v242_v30 }
  0x48   : > { %648 = vmatprep.subr.mxu0 %v257_v31 }
  0x49   : > { %649 = vmatpush3.msra.mxu0 %v241_v32 }
  0x4a   : > { %650 = vmatprep.subr.mxu0 %v256_v33 }
  0x4b   : > { %651 = vmatpush3.msra.mxu0 %v240_v34 }
  0x4c   : > { %652 = vmatprep.subr.mxu0 %v255_v35 }
  0x4d   : > { %653 = vmatpush3.msra.mxu0 %v239_v36 }
  0x4e   : > { %483 = vmatmul.mubr.f32.vlgmr.msra.gmra.mxu0 %v173_v37 }
  0xec   : > { %v584_v38 = vpop.f32.mrf.mxu0 }
  0xee   : > { %v585_v39 = vpop.f32.mrf.mxu0 }
  0xef   : > { %v619_v40 = vpop.f32.mrf.mxu1  ;;  %v586_v41 = vadd.f32 %v585_v39, %v584_v38 }
  0xf1   : > { %v620_v43 = vpop.f32.mrf.mxu1  ;;  %v345_v44 = vadd.f32 %v586_v41, %v549_v42 }
  0xf2   : > { %v621_v45 = vadd.f32 %v620_v43, %v619_v40 }
  0xf4   : > { %v415_v48 = vadd.f32 %v621_v45, %v345_v44 }
 0x10e   : > { %v654_v46 = vpop.f32.mrf.mxu0 }
 0x110   : > { %v655_v47 = vpop.f32.mrf.mxu0 }
 0x111   : > { %v656_v49 = vadd.f32 %v655_v47, %v654_v46 }
 0x113   : > { %v485_v50 = vadd.f32 %v656_v49, %v415_v48 }
 0x115   : > { %488 = vst [vmem:[%s168_s18] sm:$0xff] %v485_v50 }
 0x116 PF: > { %s13_s12 = sadd.s32 1, %s672_s12  }
 0x117   : > { %p10_p4 = scmp.ge.s32.totalorder %s13_s12, 4  }
 0x119   :  { %12 = sbr.rel (!%p10_p4) target bundleno = 1 (0x1), region = 62 }

</bundles_post_ra>
